<compile_context>
chip_gen: v7x
topology: tpu7x:2x2x1
jax: 0.10.0
libtpu: 0.0.40
codegen_flags: <defaults>
</compile_context>

<pallas_src>
import functools
from collections import deque

import jax
import jax.numpy as jnp
from jax import lax
from jax.experimental import pallas as pl
from jax.experimental.pallas import tpu as pltpu


# --------------------------------------------------------------------------- #
# Kernel                                                                      #
# --------------------------------------------------------------------------- #
def _pr_kernel(x_ref, cnt_ref, acc_ref, *, ts, n_s_per_half, s_total, needs_mask):
    """One (TR, TS) tile: threshold, masked per-lane partial count, finalize."""
    si = pl.program_id(2)                                 # reduction step

    @pl.when(si == 0)
    def _init():
        acc_ref[...] = jnp.zeros_like(acc_ref)

    x = x_ref[...]                                        # (TR, TS), native dtype
    hit = x > jnp.asarray(0.5, x.dtype)
    if needs_mask:
        # Global column index of each lane (from the UNCLAMPED grid position);
        # lanes at/after S (ragged tail or clamped duplicate block) contribute 0.
        p = pl.program_id(0)
        col0 = (p * n_s_per_half + si) * ts
        col = col0 + lax.broadcasted_iota(jnp.int32, x.shape, 1)
        hit = jnp.logical_and(hit, col < s_total)
    part = hit.astype(jnp.float32)                        # (TR, TS) of 0/1

    # Per-lane partial sums: binary-fold TS (a power-of-two multiple of 128)
    # down to 128 lanes using lane-tile-aligned VPU adds only -- no per-step
    # XLU cross-lane reduce, no per-step 1-lane masked store.
    w = ts
    while w > 128:
        w //= 2
        part = part[:, :w] + part[:, w:]
    acc_ref[...] += part                                  # (TR, 128) f32 scratch

    @pl.when(si == pl.num_programs(2) - 1)
    def _finalize():
        # Single cross-lane reduce per (half, row-block). Counts of 0/1 in f32
        # are exact up to 2^24 elements.
        cnt_ref[0] = jnp.sum(acc_ref[...], axis=-1, keepdims=True)


# --------------------------------------------------------------------------- #
# Tiling plan                                                                 #
# --------------------------------------------------------------------------- #
def _pow2_floor(n):
    return 1 << (int(n).bit_length() - 1)


def _tile_budget_bytes(default=8 * 1024 * 1024):
    """~8 MiB per input buffer (16 MiB double-buffered), trimmed if physical
    VMEM is small (v7x: 64 MiB/TC).  Safe default if the query is unavailable."""
    budget = default
    try:
        info = pltpu.get_tpu_info()
        vmem = getattr(info, "vmem_capacity_bytes", None)
        if vmem:
            budget = max(1 << 20, min(default, vmem // 6))
    except Exception:
        pass
    return budget


def _plan(R, S, itemsize, budget):
    """Pick (tr, ts, n_r, n_s, halves).

    ts is a power-of-two multiple of 128 (enables the in-kernel binary fold and
    long contiguous DMA bursts); tr is a multiple of the dtype's packed sublane
    count, or the full row extent R.  The lane axis is grown first.
    """
    tr_unit = {4: 8, 2: 16, 1: 32}.get(itemsize, 8)
    # Smallest power-of-two-times-128 covering S (one block holds a full row).
    cover = 128 * pl.next_power_of_2(pl.cdiv(S, 128))
    # Largest ts keeping a (tr_unit, ts) tile within the budget.
    ts_cap = max(128, 128 * _pow2_floor(max(1, budget // (tr_unit * itemsize * 128))))
    ts = min(cover, ts_cap)
    # Grow tr with the remaining budget (dtype-aware packing unit).
    tr = max(tr_unit, (budget // (ts * itemsize)) // tr_unit * tr_unit)
    if tr >= R:
        tr = R            # full-extent row block: always legal, no ragged rows
    n_r = pl.cdiv(R, tr)
    n_s = pl.cdiv(S, ts)
    # v7x megacore: if rows give no parallelism, split the S reduction into two
    # parallel halves (neutral on single-TC v5e/v6e).
    halves = 1
    if n_r < 2:
        if n_s < 2 and ts > 128:
            ts //= 2
            n_s = pl.cdiv(S, ts)
        if n_s >= 2:
            halves = 2
    return tr, ts, n_r, n_s, halves


# --------------------------------------------------------------------------- #
# Wrapper                                                                     #
# --------------------------------------------------------------------------- #
def compute_pr(log_output):
    """pr[b, c] = mean over (D, H, W) of (log_output[b, c] > 0.5), as f32."""
    B, C, D, H, W = log_output.shape
    R, S = B * C, D * H * W
    assert S <= (1 << 24), "f32 0/1 counts are only exact up to 2^24 voxels"
    x = log_output.reshape(R, S)                          # native dtype, no upcast

    itemsize = x.dtype.itemsize
    budget = _tile_budget_bytes()
    tr, ts, n_r, n_s, halves = _plan(R, S, itemsize, budget)
    n_s_per_half = pl.cdiv(n_s, halves)
    needs_mask = (halves * n_s_per_half * ts) != S

    if needs_mask:
        def x_index_map(p, ri, si):
            # Clamp duplicate tail blocks to the last valid block; their lanes
            # are masked to zero inside the kernel.
            return (ri, jnp.minimum(p * n_s_per_half + si, n_s - 1))
    else:
        def x_index_map(p, ri, si):
            return (ri, p * n_s_per_half + si)

    tile_bytes = tr * ts * itemsize
    vmem_limit = min(48 * 1024 * 1024, 2 * tile_bytes + 16 * 1024 * 1024)

    counts = pl.pallas_call(
        functools.partial(
            _pr_kernel,
            ts=ts,
            n_s_per_half=n_s_per_half,
            s_total=S,
            needs_mask=needs_mask,
        ),
        out_shape=jax.ShapeDtypeStruct((halves, R, 1), jnp.float32),
        grid_spec=pltpu.PrefetchScalarGridSpec(
            num_scalar_prefetch=0,
            grid=(halves, n_r, n_s_per_half),             # reduction axis last
            in_specs=[pl.BlockSpec((tr, ts), x_index_map)],
            out_specs=pl.BlockSpec((1, tr, 1), lambda p, ri, si: (p, ri, 0)),
            scratch_shapes=[pltpu.VMEM((tr, 128), jnp.float32)],
        ),
        compiler_params=pltpu.CompilerParams(
            dimension_semantics=("parallel", "parallel", "arbitrary"),
            vmem_limit_bytes=vmem_limit,
        ),
    )(x)

    # Exact integer counts per half; sum the halves, then a single scale by 1/S.
    pr = jnp.sum(counts, axis=0)[:, 0] * jnp.float32(1.0 / float(S))
    return pr.reshape(B, C)


# --------------------------------------------------------------------------- #
# Module                                                                      #
# --------------------------------------------------------------------------- #
class BalanceGate:
    def __init__(self, threshold=0.2, queue_size=5, voxel_size=(64, 64, 64)):
        self.threshold = threshold
        self.queue_size = queue_size
        self.sq = deque(maxlen=queue_size)
        self.lq = deque(maxlen=queue_size)
        self.voxel_size = voxel_size

    def forward(self, log_output):
        batch_size = log_output.shape[0]
        pr = compute_pr(log_output)                       # Pallas hot path, (B, C)
        # One small device->host transfer of the (B,) boolean decisions.
        # (PyTorch's `if pr[i] < threshold` requires C == 1, same as the spec.)
        small = jax.device_get(pr[:, 0] < self.threshold)
        for i in range(batch_size):
            if bool(small[i]):
                self.sq.append(log_output[i])
            else:
                self.lq.append(log_output[i])
        # TODO(synk): queue state is host-side Python (deques), not a device op.
        if len(self.sq) == self.queue_size and len(self.lq) == self.queue_size:
            sv = jnp.stack(list(self.sq), axis=0)
            lv = jnp.stack(list(self.lq), axis=0)
            return jnp.concatenate([sv, lv], axis=0)
        return None


# --------------------------------------------------------------------------- #
# Self-test                                                                   #
# --------------------------------------------------------------------------- #
if __name__ == "__main__":
    key = jax.random.PRNGKey(0)
    B, C, D, H, W = 4, 1, 16, 16, 32                      # S = 8192
    x = jax.random.uniform(key, (B, C, D, H, W), dtype=jnp.float32)
    # First half scaled down so its pr < threshold (small queue), second half
    # left ~U(0,1) so pr ~ 0.5 (large queue).
    scale = jnp.concatenate(
        [jnp.full((B // 2, 1, 1, 1, 1), 0.1, jnp.float32),
         jnp.ones((B // 2, 1, 1, 1, 1), jnp.float32)], axis=0)
    x = x * scale

    gate = BalanceGate(threshold=0.2, queue_size=2, voxel_size=(D, H, W))
    out = gate.forward(x)
    assert out is not None
    assert out.shape == (2 * gate.queue_size, C, D, H, W), out.shape
    jax.block_until_ready(out)

    # Cross-check kernel pr against a pure-JAX reference (f32 path).
    pr_ref = (x > 0.5).astype(jnp.float32).mean(axis=(2, 3, 4))
    pr_ker = compute_pr(x)
    assert jnp.allclose(pr_ker, pr_ref, atol=1e-6), (pr_ker, pr_ref)

    # bf16 path: streamed at native width, compared in native dtype both in the
    # kernel and in the reference, so the 0/1 counts match exactly.
    xb = x.astype(jnp.bfloat16)
    pr_ref_b = (xb > 0.5).astype(jnp.float32).mean(axis=(2, 3, 4))
    pr_ker_b = compute_pr(xb)
    assert jnp.allclose(pr_ker_b, pr_ref_b, atol=1e-6), (pr_ker_b, pr_ref_b)

    # Odd voxel shape (S = 5*7*9 = 315): exercises the cdiv grid + ragged-tail
    # lane masking and the clamped duplicate block path.
    xo = jax.random.uniform(jax.random.PRNGKey(1), (3, 1, 5, 7, 9), jnp.float32)
    pr_ref_o = (xo > 0.5).astype(jnp.float32).mean(axis=(2, 3, 4))
    pr_ker_o = compute_pr(xo)
    assert jnp.allclose(pr_ker_o, pr_ref_o, atol=1e-6), (pr_ker_o, pr_ref_o)

    jax.block_until_ready((pr_ker, pr_ker_b, pr_ker_o))
    print("KERNEL_OK")
</pallas_src>

<mosaic_0001>
module attributes {stable_mosaic.version = 11 : i64} {
  func.func @_pr_kernel(%arg0: i32, %arg1: i32, %arg2: i32, %arg3: memref<4x4096xf32, #tpu.memory_space<vmem>>, %arg4: memref<1x4x1xf32, #tpu.memory_space<vmem>>, %arg5: memref<4x128xf32, #tpu.memory_space<vmem>>) attributes {dimension_semantics = [#tpu.dimension_semantics<parallel>, #tpu.dimension_semantics<parallel>, #tpu.dimension_semantics<arbitrary>], iteration_bounds = array<i64: 2, 1, 1>, scalar_prefetch = 0 : i64, scratch_operands = 1 : i64, tpu.core_type = #tpu.core_type<tc>, window_params = [{transform_indices = @transform_0, window_bounds = array<i64: 4, 4096>}, {transform_indices = @transform_1, window_bounds = array<i64: 1, 4, 1>}]} {
    %c0_i32 = arith.constant 0 : i32
    %0 = arith.cmpi eq, %arg2, %c0_i32 : i32
    %1 = arith.extui %0 : i1 to i32
    %c0_i32_0 = arith.constant 0 : i32
    %2 = arith.cmpi ne, %1, %c0_i32_0 : i32
    scf.if %2 {
      %cst_8 = arith.constant 0.000000e+00 : f32
      %29 = vector.broadcast %cst_8 : f32 to vector<4x128xf32>
      %c0_9 = arith.constant 0 : index
      %c0_10 = arith.constant 0 : index
      %30 = vector.load %arg5[%c0_9, %c0_10] : memref<4x128xf32, #tpu.memory_space<vmem>>, vector<4x128xf32>
      tpu.vector_store %arg5[%c0_9, %c0_10], %29 {strides = array<i32>} : memref<4x128xf32, #tpu.memory_space<vmem>>, vector<4x128xf32>,
    } else {
    }
    %c0 = arith.constant 0 : index
    %c0_1 = arith.constant 0 : index
    %3 = vector.load %arg3[%c0, %c0_1] : memref<4x4096xf32, #tpu.memory_space<vmem>>, vector<4x4096xf32>
    %cst = arith.constant 5.000000e-01 : f32
    %4 = vector.broadcast %cst : f32 to vector<4x4096xf32>
    %5 = arith.cmpf ogt, %3, %4 : vector<4x4096xf32>
    %6 = arith.extui %5 : vector<4x4096xi1> to vector<4x4096xi32>
    %7 = arith.sitofp %6 : vector<4x4096xi32> to vector<4x4096xf32>
    %8 = vector.extract_strided_slice %7 {offsets = [0, 0], sizes = [4, 2048], strides = [1, 1]} : vector<4x4096xf32> to vector<4x2048xf32>
    %9 = vector.extract_strided_slice %7 {offsets = [0, 2048], sizes = [4, 2048], strides = [1, 1]} : vector<4x4096xf32> to vector<4x2048xf32>
    %10 = arith.addf %8, %9 : vector<4x2048xf32>
    %11 = vector.extract_strided_slice %10 {offsets = [0, 0], sizes = [4, 1024], strides = [1, 1]} : vector<4x2048xf32> to vector<4x1024xf32>
    %12 = vector.extract_strided_slice %10 {offsets = [0, 1024], sizes = [4, 1024], strides = [1, 1]} : vector<4x2048xf32> to vector<4x1024xf32>
    %13 = arith.addf %11, %12 : vector<4x1024xf32>
    %14 = vector.extract_strided_slice %13 {offsets = [0, 0], sizes = [4, 512], strides = [1, 1]} : vector<4x1024xf32> to vector<4x512xf32>
    %15 = vector.extract_strided_slice %13 {offsets = [0, 512], sizes = [4, 512], strides = [1, 1]} : vector<4x1024xf32> to vector<4x512xf32>
    %16 = arith.addf %14, %15 : vector<4x512xf32>
    %17 = vector.extract_strided_slice %16 {offsets = [0, 0], sizes = [4, 256], strides = [1, 1]} : vector<4x512xf32> to vector<4x256xf32>
    %18 = vector.extract_strided_slice %16 {offsets = [0, 256], sizes = [4, 256], strides = [1, 1]} : vector<4x512xf32> to vector<4x256xf32>
    %19 = arith.addf %17, %18 : vector<4x256xf32>
    %20 = vector.extract_strided_slice %19 {offsets = [0, 0], sizes = [4, 128], strides = [1, 1]} : vector<4x256xf32> to vector<4x128xf32>
    %21 = vector.extract_strided_slice %19 {offsets = [0, 128], sizes = [4, 128], strides = [1, 1]} : vector<4x256xf32> to vector<4x128xf32>
    %22 = arith.addf %20, %21 : vector<4x128xf32>
    %c0_2 = arith.constant 0 : index
    %c0_3 = arith.constant 0 : index
    %23 = vector.load %arg5[%c0_2, %c0_3] : memref<4x128xf32, #tpu.memory_space<vmem>>, vector<4x128xf32>
    %24 = arith.addf %23, %22 : vector<4x128xf32>
    %c0_4 = arith.constant 0 : index
    %c0_5 = arith.constant 0 : index
    %25 = vector.load %arg5[%c0_4, %c0_5] : memref<4x128xf32, #tpu.memory_space<vmem>>, vector<4x128xf32>
    tpu.vector_store %arg5[%c0_4, %c0_5], %24 {strides = array<i32>} : memref<4x128xf32, #tpu.memory_space<vmem>>, vector<4x128xf32>,
    %c0_i32_6 = arith.constant 0 : i32
    %26 = arith.cmpi eq, %arg2, %c0_i32_6 : i32
    %27 = arith.extui %26 : i1 to i32
    %c0_i32_7 = arith.constant 0 : i32
    %28 = arith.cmpi ne, %27, %c0_i32_7 : i32
    scf.if %28 {
      %c0_8 = arith.constant 0 : index
      %c0_9 = arith.constant 0 : index
      %29 = vector.load %arg5[%c0_8, %c0_9] : memref<4x128xf32, #tpu.memory_space<vmem>>, vector<4x128xf32>
      %cst_10 = arith.constant dense<0.000000e+00> : vector<4xf32>
      %30 = vector.multi_reduction <add>, %29, %cst_10 [1] : vector<4x128xf32> to vector<4xf32>
      %31 = vector.shape_cast %30 : vector<4xf32> to vector<4x1xf32>
      %c0_11 = arith.constant 0 : index
      %c0_12 = arith.constant 0 : index
      %c0_13 = arith.constant 0 : index
      %32 = vector.load %arg4[%c0_11, %c0_12, %c0_13] : memref<1x4x1xf32, #tpu.memory_space<vmem>>, vector<1x4x1xf32>
      %33 = vector.shape_cast %32 : vector<1x4x1xf32> to vector<4x1xf32>
      %34 = vector.shape_cast %31 : vector<4x1xf32> to vector<1x4x1xf32>
      tpu.vector_store %arg4[%c0_11, %c0_12, %c0_13], %34 {strides = array<i32>} : memref<1x4x1xf32, #tpu.memory_space<vmem>>, vector<1x4x1xf32>,
    } else {
    }
    return
  }
  func.func @transform_0(%arg0: i32, %arg1: i32, %arg2: i32) -> (i32, i32) {
    %c1_i32 = arith.constant 1 : i32
    %0 = arith.muli %arg0, %c1_i32 : i32
    %1 = arith.addi %0, %arg2 : i32
    %c0_i32 = arith.constant 0 : i32
    return %arg1, %1 : i32, i32
  }
  func.func @transform_1(%arg0: i32, %arg1: i32, %arg2: i32) -> (i32, i32, i32) {
    %c0_i32 = arith.constant 0 : i32
    %c0_i32_0 = arith.constant 0 : i32
    return %arg0, %arg1, %c0_i32 : i32, i32, i32
  }
}

</mosaic_0001>

<bundles_post_ra>
// kernel: tpu_custom_call.1
= control target key start
LH: loop header
LB: loop body
LE: loop exit
PB: predicated region body
PF: predicated region fallthrough
CT: control target
= control target key end

     0   :  { %6 = vsyncpa [#allocation4], 0  ;;  %s697_s0 = inlined_call_operand.hbm [shape: f32[4,8192], index: 0, kind: input, shape index: {}]   ;;  %s698_s1 = inlined_call_operand.vmem [shape: f32[2,4,1], index: 1, kind: output, shape index: {}]  }
   0x1   :  { %8 = vsyncpa [#allocation4 + $0x1], 0  ;;  %s539_s6 = smov 0   ;;  %s541_s7 = smov 0  }
   0x2   :  { %s543_s8 = smov 0   ;;  %s545_s9 = smov 0  }
   0x3   :  { %s547_s10 = smov 0   ;;  %s549_s11 = smov 0  }
   0x4 LB: > { %s360_s12 = sadd.s32 4294967295, %s525_s11   ;;  %s33_s13 = sadd.s32 1, %s521_s10  ;;  %s525_s11 = sphi %s549_s11, %s14_s11   ;;  %s521_s10 = sphi %s547_s10, %s708_s10   ;;  %s517_s9 = sphi %s545_s9, %s707_s9   ;;  %s513_s8 = sphi %s543_s8, %s706_s8   ;;  %s509_s7 = sphi %s541_s7, %s705_s7   ;;  %s505_s6 = sphi %s539_s6, %s704_s6  }
   0x5   : > { %p35_p0 = scmp.ge.s32.totalorder %s33_s13, 2  ;;  %s44_s14 = sadd.s32 1, %s513_s8 }
   0x6   : > { %p51_p1 = scmp.ne.s32.totalorder %s513_s8, %s509_s7  ;;  %p52_p2 = scmp.eq.s32.totalorder %s525_s11, 0 }
   0x7   : > { %s710_s13 = smov (%p35_p0, %s33_s13), 0  ;;  %p57_p4 = scmp.ne.s32.totalorder %s509_s7, %s505_s6 }
   0x8   : > { %p575_p3 = por %p52_p2, %p51_p1  ;;  %s40_s16 = ssub.s32 %s521_s10, %s710_s13 }
   0x9   : > { %p58_p5 = scmp.eq.s32.totalorder %s360_s12, 0  ;;  %p42_p6 = scmp.eq.s32.totalorder %s40_s16, 0 }
   0xa   : > { %p395_p8 = scmp.lt.s32.totalorder %s525_s11, 2  ;;  %s109_s19 = sand.u32 1, %s513_s8  }
   0xb   : > { %p582_p7 = por %p58_p5, %p57_p4  ;;  %s388_s20 = sshll.u32 %s521_s10, 11 }
   0xc   : > { %s588_s18 = scalar_select %p42_p6, %s513_s8, %s44_s14  }
   0xd   : > { %s364_s21 = sshll.u32 %s109_s19, 7  ;;  %s595_s24 = scalar_lea.hbm %s697_s0, %s388_s20 }
   0xe   : > { %s113_s25 = scalar_lea.vmem [#allocation3], %s364_s21  ;;  %p599_p9 = pnand %p395_p8, %p575_p3 }
   0xf   : > { %s124_s26 = sshll.u32 %s113_s25, 4  ;;  %s110_s28 = scalar_lea.sflag [#allocation4], %s109_s19  ;;  %s603_s26 = int_to_ptr.vmem [resolvable:$true] %s124_s26 }
  0x10   : > { %s445_s29 = scalar_lea.hbm %s595_s24, 2048  ;;  %p447_p13 = pneg %p599_p9 }
  0x11   : > { %p446_p12 = scmp.ne.s32.totalorder %s595_s24, %s445_s29  ;;  %s450_s3 = scalar_lea.hbm %s697_s0, 4096 }
  0x12   : > { %p451_p2 = scmp.lt.u32.totalorder %s595_s24, %s697_s0  ;;  %p452_p3 = scmp.lt.u32.totalorder %s450_s3, %s445_s29 }
  0x13   : > { %p448_p0 = pnand %p447_p13, %p446_p12  ;;  %p454_p5 = scmp.lt.u32.totalorder %s445_s29, %s595_s24 }
  0x14   : > { %p453_p4 = por %p452_p3, %p451_p2 }
  0x15   : > { %p449_p1 = pneg %p448_p0 }
  0x16   : > { %p455_p6 = por %p454_p5, %p453_p4 }
  0x18   : > { %p456_p8 = pnand %p455_p6, %p449_p1 }
  0x1a   : > { %459 = shalt.err (!%p456_p8)
}
  0x1b   : > { %s460_s6 = scalar_lea.vmem %s603_s26, 2048  ;;  %s527_s12 = smov [#allocation3]  }
  0x1c   : > { %p461_p12 = scmp.ne.s32.totalorder %s603_s26, %s460_s6  ;;  %s465_s14 = sshll.u32 %s527_s12, 4  ;;  %s466_s14 = int_to_ptr.vmem [resolvable:$false] %s465_s14 }
  0x1d   : > { %s467_s15 = scalar_lea.vmem %s466_s14, 4096  ;;  %p468_p11 = scmp.lt.s32.totalorder %s603_s26, %s466_s14 }
  0x1e   : > { %p463_p0 = pnand %p461_p12, %p447_p13  ;;  %p469_p2 = scmp.lt.s32.totalorder %s467_s15, %s460_s6 }
  0x20   : > { %p464_p10 = pneg %p463_p0  ;;  %p470_p3 = por %p469_p2, %p468_p11 }
  0x22   : > { %p471_p4 = pnand %p470_p3, %p464_p10 }
  0x24   : > { %474 = shalt.err (!%p471_p4)
}
  0x25   : > { %394 = dma.hbm_to_vmem [thread:$0]  (!%p599_p9), %s595_s24, 2048, %s603_s26, %s110_s28  }
  0x26   : > { %p702_p1 = scmp.lt.s32.totalorder %s525_s11, 3  ;;  %p703_p5 = scmp.ge.s32.totalorder %s525_s11, 1 }
  0x28   : > { %p130_p13 = pnand %p703_p5, %p702_p1 }
  0x29   : > { %s135_s16 = sand.u32 (!%p130_p13), 1, %s509_s7  }
  0x2a   : > { %133 = sbr.rel (%p130_p13) target bundleno = 228 (0xe4), region = 24  ;;  %s368_s19 = sshll.u32 (!%p130_p13), %s135_s16, 7 }
  0x2b   : > { %s136_s20 = scalar_lea.sflag (!%p130_p13), [#allocation4], %s135_s16  ;;  %s637_s21 = scalar_lea.vmem (!%p130_p13), [#allocation3], %s368_s19 }
  0x31   : > { %500 = dma.done.wait (%p582_p7), %s136_s20, 2048  }
  0x32   : > { %502 = vsyncadd (%p582_p7), %s136_s20, 4294965248  ;;  %v528_v0 = vmov 0.0   ;;  %v174_v1 = vld [vmem:[%s637_s21] sm:$0xff]  ;;  %v175_v2 = vld [vmem:[%s637_s21 + $0x8] sm:$0xff]  ;;  %p162_p7 = scmp.lt.s32.totalorder %s517_s9, 1 }
  0x33   : > { %173 = vst [vmem:[#allocation2] sm:$0xf] %v528_v0  ;;  %v176_v3 = vld [vmem:[%s637_s21 + $0x10] sm:$0xff]  ;;  %v177_v4 = vld [vmem:[%s637_s21 + $0x18] sm:$0xff]  ;;  %v178_v5 = vld [vmem:[%s637_s21 + $0x20] sm:$0xff]  ;;  %vm190_vm0 = vcmp.gt.f32.partialorder %v174_v1, 0.5 }
  0x34   : > { %v179_v6 = vld [vmem:[%s637_s21 + $0x28] sm:$0xff]  ;;  %vm191_vm1 = vcmp.gt.f32.partialorder %v175_v2, 0.5  ;;  %vm192_vm2 = vcmp.gt.f32.partialorder %v176_v3, 0.5  ;;  %v180_v7 = vld [vmem:[%s637_s21 + $0x30] sm:$0xff]  ;;  %v181_v8 = vld [vmem:[%s637_s21 + $0x38] sm:$0xff]  ;;  %vm193_vm3 = vcmp.gt.f32.partialorder %v177_v4, 0.5 }
  0x35   : > { %v182_v9 = vld [vmem:[%s637_s21 + $0x40] sm:$0xff]  ;;  %vm194_vm4 = vcmp.gt.f32.partialorder %v178_v5, 0.5  ;;  %vm195_vm5 = vcmp.gt.f32.partialorder %v179_v6, 0.5  ;;  %v183_v10 = vld [vmem:[%s637_s21 + $0x48] sm:$0xff]  ;;  %v184_v11 = vld [vmem:[%s637_s21 + $0x50] sm:$0xff]  ;;  %vm196_vm6 = vcmp.gt.f32.partialorder %v180_v7, 0.5 }
  0x36   : > { %v185_v12 = vld [vmem:[%s637_s21 + $0x58] sm:$0xff]  ;;  %vm197_vm7 = vcmp.gt.f32.partialorder %v181_v8, 0.5  ;;  %vm198_vm8 = vcmp.gt.f32.partialorder %v182_v9, 0.5  ;;  %v186_v13 = vld [vmem:[%s637_s21 + $0x60] sm:$0xff]  ;;  %v187_v14 = vld [vmem:[%s637_s21 + $0x68] sm:$0xff]  ;;  %vm199_vm9 = vcmp.gt.f32.partialorder %v183_v10, 0.5 }
  0x37   : > { %v188_v15 = vld [vmem:[%s637_s21 + $0x70] sm:$0xff]  ;;  %vm200_vm10 = vcmp.gt.f32.partialorder %v184_v11, 0.5  ;;  %vm201_vm11 = vcmp.gt.f32.partialorder %v185_v12, 0.5  ;;  %v189_v16 = vld [vmem:[%s637_s21 + $0x78] sm:$0xff]  ;;  %vm202_vm12 = vcmp.gt.f32.partialorder %v186_v13, 0.5  ;;  %vm203_vm13 = vcmp.gt.f32.partialorder %v187_v14, 0.5 }
  0x38   : > { %vm204_vm14 = vcmp.gt.f32.partialorder %v188_v15, 0.5  ;;  %v370_v17 = vsel %vm190_vm0, 1.0, %v528_v0  ;;  %vm205_vm15 = vcmp.gt.f32.partialorder %v189_v16, 0.5  ;;  %v371_v18 = vsel %vm191_vm1, 1.0, %v528_v0  ;;  %s712_s9 = smov (!%p162_p7, %s517_s9), 1 }
  0x39   : > { %v372_v19 = vsel %vm192_vm2, 1.0, %v528_v0  ;;  %v373_v20 = vsel %vm193_vm3, 1.0, %v528_v0  ;;  %v374_v21 = vsel %vm194_vm4, 1.0, %v528_v0  ;;  %v375_v22 = vsel %vm195_vm5, 1.0, %v528_v0  ;;  %s369_s17 = sshll.u32 %s712_s9, 2 }
  0x3a   : > { %v376_v23 = vsel %vm196_vm6, 1.0, %v528_v0  ;;  %v377_v24 = vsel %vm197_vm7, 1.0, %v528_v0  ;;  %v378_v25 = vsel %vm198_vm8, 1.0, %v528_v0  ;;  %v379_v26 = vsel %vm199_vm9, 1.0, %v528_v0  ;;  %v257_v49 = vld [vmem:[#allocation2] sm:$0xf]  ;;  %s168_s24 = scalar_lea.vmem %s698_s1, %s369_s17 }
  0x3b   : > { %v380_v27 = vsel %vm200_vm10, 1.0, %v528_v0  ;;  %v381_v28 = vsel %vm201_vm11, 1.0, %v528_v0  ;;  %v382_v29 = vsel %vm202_vm12, 1.0, %v528_v0  ;;  %v383_v30 = vsel %vm203_vm13, 1.0, %v528_v0 }
  0x3c   : > { %v384_v31 = vsel %vm204_vm14, 1.0, %v528_v0  ;;  %v385_v32 = vsel %vm205_vm15, 1.0, %v528_v0  ;;  %v238_v33 = vadd.f32 %v378_v25, %v370_v17  ;;  %v239_v34 = vadd.f32 %v379_v26, %v371_v18 }
  0x3d   : > { %v240_v35 = vadd.f32 %v380_v27, %v372_v19  ;;  %v241_v36 = vadd.f32 %v381_v28, %v373_v20  ;;  %v242_v37 = vadd.f32 %v382_v29, %v374_v21  ;;  %v243_v38 = vadd.f32 %v383_v30, %v375_v22 }
  0x3e   : > { %v244_v39 = vadd.f32 %v384_v31, %v376_v23  ;;  %v245_v40 = vadd.f32 %v385_v32, %v377_v24  ;;  %vm264_vm0 = vcmask 1043456   ;;  %vm268_vm1 = vcmask 3072  }
  0x3f   : > { %v246_v41 = vadd.f32 %v242_v37, %v238_v33  ;;  %v247_v42 = vadd.f32 %v243_v38, %v239_v34 }
  0x40   : > { %v248_v43 = vadd.f32 %v244_v39, %v240_v35  ;;  %v249_v44 = vadd.f32 %v245_v40, %v241_v36 }
  0x42   : > { %v250_v45 = vadd.f32 %v248_v43, %v246_v41  ;;  %v251_v46 = vadd.f32 %v249_v44, %v247_v42 }
  0x44   : > { %v252_v47 = vadd.f32 %v251_v46, %v250_v45 }
  0x46   : > { %v254_v48 = vrot.slane %v252_v47, 4 }
  0x48   : > { %v256_v50 = vadd.f32 %v254_v48, %v252_v47 }
  0x4a   : > { %v258_v51 = vadd.f32 %v257_v49, %v256_v50 }
  0x4c   : > { %259 = vst [vmem:[#allocation2] sm:$0xf] %v258_v51 }
  0x53   : > { %v263_v52 = vld [vmem:[#allocation2] sm:$0xf] }
  0x54   : > { %v265_v53 = vsel %vm264_vm0, %v263_v52, 0.0 }
  0x55   : > { %266 = vadd.xlane.f32.xlu0 %v265_v53 }
  0xe2   : > { %v267_v54 = vpop.xlane.xlu0 %266 }
  0xe3   : > { %269 = vst.msk [vmem:[%s168_s24] sm:$0xf] %vm268_vm1, %v267_v54 }
  0xe4 PF: > { %s14_s11 = sadd.s32 1, %s525_s11   ;;  %s704_s6 = smov %s509_s7 }
  0xe5   : > { %p11_p9 = scmp.ge.s32.totalorder %s14_s11, 4   ;;  %s705_s7 = smov %s513_s8 }
  0xe6   : > { %s706_s8 = smov %s588_s18  ;;  %s707_s9 = smov %s521_s10 }
  0xe7   : > { %s708_s10 = smov %s710_s13  ;;  %13 = sbr.rel (!%p11_p9) target bundleno = 4 (0x4), region = 72 }
  0xee   :  { %295 = vsyncpa [#allocation4], 1 }
  0xef   :  { %297 = vsyncpa [#allocation4 + $0x1], 1 }

</bundles_post_ra>
